<compile_context>
chip_gen: v7x
topology: tpu7x:2x2x1
jax: 0.10.0
libtpu: 0.0.40
codegen_flags: <defaults>
</compile_context>

<pallas_src>
import jax
import jax.numpy as jnp
import numpy as np
from jax.experimental import pallas as pl
from jax.experimental.pallas import tpu as pltpu

# ----------------- config (synthetic, consistent with YOGO.__init__) ---------
IMG_H, IMG_W = 16, 16
NUM_CLASSES = 4
ANCHOR_W, ANCHOR_H = 0.05, 0.07
IS_RGB = False
IN_CH = 3 if IS_RGB else 1
HID_CH = 16                          # stand-in backbone hidden width
OUT_CH = 5 + NUM_CLASSES
SY, SX = IMG_H // 2, IMG_W // 2      # grid size implied by the 3x3 s2 conv
HEIGHT_MULT = 1.0                    # height_multiplier buffer
WIDTH_MULT = 1.0                     # width_multiplier buffer
LEAKY_SLOPE = 0.01
INFERENCE = False                    # YOGO default: classification passthrough
LANE = 128                           # channel padding target (lane-dense)


def _round_up(x, m):
    return (x + m - 1) // m * m


# ----------------- fused conv1 + conv2 + YOGO-head kernel --------------------
def _fused_yogo_kernel(a_ref, w1_ref, b1_ref, w2_ref, b2_ref,
                       sscale_ref, escale_ref, o_ref):
    """One (tm, 128) row-tile of the im2col'd input -> final head output.

    K of both matmuls is exactly 128 (zero-padded), so there is no K grid axis
    and no accumulator scratch: the whole tile lives in vregs.
    """
    tm = a_ref.shape[0]

    # conv1 (3x3 s2 p1, already im2col'd) + bias + LeakyReLU, f32 accumulation.
    h = jnp.dot(a_ref[...], w1_ref[...], preferred_element_type=jnp.float32)
    h = h + b1_ref[...]
    h = jnp.where(h > 0, h, LEAKY_SLOPE * h)

    # conv2 (1x1): hidden channels already sit on lanes -> plain row matmul.
    z = jnp.dot(h.astype(jnp.bfloat16), w2_ref[...],
                preferred_element_type=jnp.float32)
    z = z + b2_ref[...]

    # ---- YOGO head ----------------------------------------------------------
    # Rows are flattened (n, y, x) grid cells, channels on lanes:
    #   lane 0: 1/Sx*sigmoid + Cx    lane 1: 1/Sy*sigmoid + Cy
    #   lane 2: aw*exp(clamp)        lane 3: ah*exp(clamp)
    #   lane 4: sigmoid              lanes 5..: classification
    lane = jax.lax.broadcasted_iota(jnp.int32, z.shape, 1)
    row = pl.program_id(0) * tm + jax.lax.broadcasted_iota(jnp.int32, z.shape, 0)

    # power-of-two grid -> cx/cy via and/mul/floor (all VPU, no div).
    x_idx = (row & (SX - 1)).astype(jnp.float32)
    yx = (row & (SX * SY - 1)).astype(jnp.float32)        # y*Sx + x within image
    y_idx = jnp.floor(yx * (1.0 / SX))                    # exact: SX is pow-2
    cx = x_idx * (1.0 / SX)
    cy = y_idx * (1.0 / SY)

    sig = jax.nn.sigmoid(z)                    # EUP (otherwise-idle slot)
    ex = jnp.exp(jnp.minimum(z, 80.0))         # torch.clamp(max=80) -> exp

    cls = z
    if INFERENCE:
        m = (lane >= 5) & (lane < 5 + NUM_CLASSES)
        zm = jnp.where(m, z, -jnp.inf)
        mx = jnp.max(zm, axis=1, keepdims=True)
        e = jnp.where(m, jnp.exp(z - mx), 0.0)
        cls = e / jnp.sum(e, axis=1, keepdims=True)   # exact div: matches softmax

    # Two short select groups instead of the old 5-deep chain.
    is_sig = (lane < 2) | (lane == 4)
    is_exp = (lane == 2) | (lane == 3)
    off = jnp.where(lane == 0, cx, jnp.where(lane == 1, cy, 0.0))
    out = jnp.where(is_sig, sscale_ref[...] * sig + off,
          jnp.where(is_exp, escale_ref[...] * ex, cls))
    o_ref[...] = out.astype(o_ref.dtype)


def fused_yogo_call(a, w1p, b1p, w2p, b2p, sscale, escale, tm):
    Mp, K = a.shape
    assert K == LANE and Mp % tm == 0
    row_spec = lambda i: (i, 0)
    res_spec = lambda i: (0, 0)            # resident weights / biases / scales
    return pl.pallas_call(
        _fused_yogo_kernel,
        out_shape=jax.ShapeDtypeStruct((Mp, LANE), jnp.float32),
        grid_spec=pltpu.PrefetchScalarGridSpec(
            num_scalar_prefetch=0,
            grid=(Mp // tm,),
            in_specs=[
                pl.BlockSpec((tm, LANE), row_spec),
                pl.BlockSpec((LANE, LANE), res_spec),
                pl.BlockSpec((1, LANE), res_spec),
                pl.BlockSpec((LANE, LANE), res_spec),
                pl.BlockSpec((1, LANE), res_spec),
                pl.BlockSpec((1, LANE), res_spec),
                pl.BlockSpec((1, LANE), res_spec),
            ],
            out_specs=pl.BlockSpec((tm, LANE), row_spec),
        ),
        compiler_params=pltpu.CompilerParams(
            # Single M axis, "parallel" -> shards across v7x's 2 TensorCores
            # (tiling guarantees >= 2 tiles when M > 8).  VMEM per grid step:
            # 2x(tm,128) bf16 in + 2x(tm,128) f32 out + resident 2x32 KiB
            # weights ~ < 2 MiB at tm=1024 — safe even on v7x (64 MiB physical).
            dimension_semantics=("parallel",),
            vmem_limit_bytes=32 * 1024 * 1024,
        ),
    )(a, w1p, b1p, w2p, b2p, sscale, escale)


# ----------------- wrapper glue -----------------------------------------------
def choose_tiling(M):
    """tm multiple of 8 (sublane), capped at 1024, and >= 2 M-tiles when M > 8
    so dimension_semantics='parallel' actually engages both v7x TensorCores."""
    tm = min(1024, _round_up(M, 8))
    if M > 8:
        tm = min(tm, max(8, _round_up((M + 1) // 2, 8)))
    Mp = _round_up(M, tm)
    return tm, Mp


def im2col_nhwc(x, k, stride, pad):
    """(N,C,H,W) -> (N*Ho*Wo, C*k*k) rows in (n,y,x) order, columns flattened
    c-major/(kh,kw)-minor to match the torch OIHW weight flatten."""
    N, C, H, W = x.shape
    xp = jnp.pad(x, ((0, 0), (0, 0), (pad, pad), (pad, pad)))
    Ho = (H + 2 * pad - k) // stride + 1
    Wo = (W + 2 * pad - k) // stride + 1
    cols = jnp.stack(
        [xp[:, :, i:i + stride * Ho:stride, j:j + stride * Wo:stride]
         for i in range(k) for j in range(k)], axis=-1)          # (N,C,Ho,Wo,k*k)
    cols = cols.transpose(0, 2, 3, 1, 4).reshape(N * Ho * Wo, C * k * k)
    # TODO(synk): at production image sizes, gather the 3x3 patches in-kernel
    # (padded NHWC input in HBM via memory_space=pl.ANY + double-buffered DMA)
    # instead of materializing k*k shifted copies in the wrapper.
    return cols, Ho, Wo


def pack_conv_params(weight, bias):
    """torch (Cout,Cin,kh,kw) conv weight -> (K_pad,LANE) bf16, bias -> (1,LANE) f32."""
    cout, cin, kh, kw = weight.shape
    K = cin * kh * kw
    w2d = weight.reshape(cout, K).T                          # (K, Cout)
    Kp = _round_up(K, LANE)
    wp = jnp.zeros((Kp, LANE), jnp.float32).at[:K, :cout].set(w2d).astype(jnp.bfloat16)
    bp = jnp.zeros((1, LANE), jnp.float32).at[0, :cout].set(bias)
    return wp, bp, Kp


# per-lane head scale constants (sigmoid-lane / exp-lane groups)
_HEAD_SIG_SCALE = np.zeros((1, LANE), np.float32)
_HEAD_SIG_SCALE[0, 0] = 1.0 / SX
_HEAD_SIG_SCALE[0, 1] = 1.0 / SY
_HEAD_SIG_SCALE[0, 4] = 1.0
_HEAD_EXP_SCALE = np.zeros((1, LANE), np.float32)
_HEAD_EXP_SCALE[0, 2] = ANCHOR_W * WIDTH_MULT
_HEAD_EXP_SCALE[0, 3] = ANCHOR_H * HEIGHT_MULT


@jax.jit
def yogo_forward(x, params):
    (w1, b1), (w2, b2) = params
    N = x.shape[0]
    # TODO(synk): general (non pow-2) Sx/Sy needs integer div/mod cx/cy math.
    assert SX & (SX - 1) == 0 and SY & (SY - 1) == 0

    # conv1 im2col (wrapper glue, fused by XLA under jit)
    cols, Ho, Wo = im2col_nhwc(x, 3, 2, 1)
    assert Ho == SY and Wo == SX
    M, K1 = cols.shape
    assert K1 <= LANE
    tm, Mp = choose_tiling(M)

    # padded lane-dense bf16 slab built in one shot
    a = jnp.pad(cols.astype(jnp.bfloat16), ((0, Mp - M), (0, LANE - K1)))

    w1p, b1p, k1p = pack_conv_params(w1, b1)
    w2p, b2p, k2p = pack_conv_params(w2, b2)
    assert k1p == LANE and k2p == LANE     # fused kernel assumes degenerate K

    out = fused_yogo_call(a, w1p, b1p, w2p, b2p,
                          jnp.asarray(_HEAD_SIG_SCALE),
                          jnp.asarray(_HEAD_EXP_SCALE), tm)

    # Back to the PyTorch NCHW output layout (single fused slice+reshape+
    # transpose under jit).  Padding rows M..Mp carry head(bias-only) values
    # and are dropped here — never reduce over the padded slab.
    # TODO(synk): consumers that accept NHWC / the flat lane slab can skip this.
    return out[:M, :OUT_CH].reshape(N, SY, SX, OUT_CH).transpose(0, 3, 1, 2)


# ----------------- deterministic parameter init (YOGO.init_network_weights) --
def kaiming_conv_init(key, cout, cin, k):
    # kaiming_normal_(a=0.01, mode='fan_out', nonlinearity='leaky_relu'); bias = 0
    fan_out = cout * k * k
    gain = float(np.sqrt(2.0 / (1.0 + 0.01 ** 2)))
    std = gain / float(np.sqrt(fan_out))
    w = std * jax.random.normal(key, (cout, cin, k, k), dtype=jnp.float32)
    b = jnp.zeros((cout,), jnp.float32)
    return w, b


# ----------------- pure-JAX reference (same bf16 quantization points) --------
def ref_forward(x, params):
    (w1, b1), (w2, b2) = params
    q = lambda t: t.astype(jnp.bfloat16).astype(jnp.float32)
    dn = ('NCHW', 'OIHW', 'NCHW')
    h = jax.lax.conv_general_dilated(q(x), q(w1), (2, 2), ((1, 1), (1, 1)),
                                     dimension_numbers=dn,
                                     precision=jax.lax.Precision.HIGHEST)
    h = h + b1[None, :, None, None]
    h = jnp.where(h > 0, h, LEAKY_SLOPE * h)
    h = q(h)                                   # kernel feeds hidden to MXU as bf16
    z = jax.lax.conv_general_dilated(h, q(w2), (1, 1), ((0, 0), (0, 0)),
                                     dimension_numbers=dn,
                                     precision=jax.lax.Precision.HIGHEST)
    z = z + b2[None, :, None, None]
    Sy, Sx = z.shape[2], z.shape[3]
    cxs = jnp.broadcast_to(jnp.linspace(0.0, 1.0 - 1.0 / Sx, Sx)[None, :], (Sy, Sx))
    cys = jnp.broadcast_to(jnp.linspace(0.0, 1.0 - 1.0 / Sy, Sy)[:, None], (Sy, Sx))
    sig = jax.nn.sigmoid
    tx = (1.0 / Sx) * sig(z[:, 0:1]) + cxs
    ty = (1.0 / Sy) * sig(z[:, 1:2]) + cys
    tw = ANCHOR_W * jnp.exp(jnp.minimum(z[:, 2:3], 80.0)) * WIDTH_MULT
    th = ANCHOR_H * jnp.exp(jnp.minimum(z[:, 3:4], 80.0)) * HEIGHT_MULT
    to = sig(z[:, 4:5])
    cls = z[:, 5:]
    if INFERENCE:
        cls = jax.nn.softmax(cls, axis=1)
    return jnp.concatenate([tx, ty, tw, th, to, cls], axis=1)


if __name__ == "__main__":
    key = jax.random.PRNGKey(0)
    k1, k2, kx = jax.random.split(key, 3)
    w1, b1 = kaiming_conv_init(k1, HID_CH, IN_CH, 3)
    w2, b2 = kaiming_conv_init(k2, OUT_CH, HID_CH, 1)
    params = ((w1, b1), (w2, b2))

    x = jax.random.normal(kx, (2, IN_CH, IMG_H, IMG_W), dtype=jnp.float32)

    out = jax.block_until_ready(yogo_forward(x, params))
    assert out.shape == (2, OUT_CH, SY, SX), out.shape

    ref = jax.block_until_ready(ref_forward(x, params))
    np.testing.assert_allclose(np.asarray(out), np.asarray(ref),
                               rtol=1e-3, atol=1e-3)
    print("KERNEL_OK")
</pallas_src>

<mosaic_0001>
module attributes {stable_mosaic.version = 11 : i64} {
  func.func @_fused_yogo_kernel(%arg0: i32, %arg1: memref<64x128xbf16, #tpu.memory_space<vmem>>, %arg2: memref<128x128xbf16, #tpu.memory_space<vmem>>, %arg3: memref<1x128xf32, #tpu.memory_space<vmem>>, %arg4: memref<128x128xbf16, #tpu.memory_space<vmem>>, %arg5: memref<1x128xf32, #tpu.memory_space<vmem>>, %arg6: memref<1x128xf32, #tpu.memory_space<vmem>>, %arg7: memref<1x128xf32, #tpu.memory_space<vmem>>, %arg8: memref<64x128xf32, #tpu.memory_space<vmem>>) attributes {dimension_semantics = [#tpu.dimension_semantics<parallel>], iteration_bounds = array<i64: 2>, scalar_prefetch = 0 : i64, scratch_operands = 0 : i64, tpu.core_type = #tpu.core_type<tc>, window_params = [{transform_indices = @transform_0, window_bounds = array<i64: 64, 128>}, {pipeline_mode = #tpu.pipeline_mode<synchronous>, transform_indices = @transform_1, window_bounds = array<i64: 128, 128>}, {pipeline_mode = #tpu.pipeline_mode<synchronous>, transform_indices = @transform_2, window_bounds = array<i64: 1, 128>}, {pipeline_mode = #tpu.pipeline_mode<synchronous>, transform_indices = @transform_3, window_bounds = array<i64: 128, 128>}, {pipeline_mode = #tpu.pipeline_mode<synchronous>, transform_indices = @transform_4, window_bounds = array<i64: 1, 128>}, {pipeline_mode = #tpu.pipeline_mode<synchronous>, transform_indices = @transform_5, window_bounds = array<i64: 1, 128>}, {pipeline_mode = #tpu.pipeline_mode<synchronous>, transform_indices = @transform_6, window_bounds = array<i64: 1, 128>}, {transform_indices = @transform_7, window_bounds = array<i64: 64, 128>}]} {
    %c0 = arith.constant 0 : index
    %c0_0 = arith.constant 0 : index
    %0 = vector.load %arg1[%c0, %c0_0] : memref<64x128xbf16, #tpu.memory_space<vmem>>, vector<64x128xbf16>
    %c0_1 = arith.constant 0 : index
    %c0_2 = arith.constant 0 : index
    %1 = vector.load %arg2[%c0_1, %c0_2] : memref<128x128xbf16, #tpu.memory_space<vmem>>, vector<128x128xbf16>
    %cst = arith.constant dense<0.000000e+00> : vector<64x128xf32>
    %2 = tpu.matmul %0, %1, %cst {dimension_numbers = #tpu.dot_dimension_numbers<[1], [0], [0], [1], [0, 0, 1, 1], [], []>} : vector<64x128xbf16>, vector<128x128xbf16>, vector<64x128xf32> -> vector<64x128xf32>
    %c0_3 = arith.constant 0 : index
    %c0_4 = arith.constant 0 : index
    %3 = vector.load %arg3[%c0_3, %c0_4] : memref<1x128xf32, #tpu.memory_space<vmem>>, vector<1x128xf32>
    %4 = vector.broadcast %3 : vector<1x128xf32> to vector<64x128xf32>
    %5 = arith.addf %2, %4 : vector<64x128xf32>
    %cst_5 = arith.constant 0.000000e+00 : f32
    %6 = vector.broadcast %cst_5 : f32 to vector<64x128xf32>
    %7 = arith.cmpf ogt, %5, %6 : vector<64x128xf32>
    %cst_6 = arith.constant 0.00999999977 : f32
    %8 = vector.broadcast %cst_6 : f32 to vector<64x128xf32>
    %9 = arith.mulf %8, %5 : vector<64x128xf32>
    %10 = arith.select %7, %5, %9 : vector<64x128xi1>, vector<64x128xf32>
    %11 = arith.truncf %10 : vector<64x128xf32> to vector<64x128xbf16>
    %c0_7 = arith.constant 0 : index
    %c0_8 = arith.constant 0 : index
    %12 = vector.load %arg4[%c0_7, %c0_8] : memref<128x128xbf16, #tpu.memory_space<vmem>>, vector<128x128xbf16>
    %cst_9 = arith.constant dense<0.000000e+00> : vector<64x128xf32>
    %13 = tpu.matmul %11, %12, %cst_9 {dimension_numbers = #tpu.dot_dimension_numbers<[1], [0], [0], [1], [0, 0, 1, 1], [], []>} : vector<64x128xbf16>, vector<128x128xbf16>, vector<64x128xf32> -> vector<64x128xf32>
    %c0_10 = arith.constant 0 : index
    %c0_11 = arith.constant 0 : index
    %14 = vector.load %arg5[%c0_10, %c0_11] : memref<1x128xf32, #tpu.memory_space<vmem>>, vector<1x128xf32>
    %15 = vector.broadcast %14 : vector<1x128xf32> to vector<64x128xf32>
    %16 = arith.addf %13, %15 : vector<64x128xf32>
    %17 = tpu.iota {dimensions = array<i32: 1>} : vector<64x128xi32>
    %c64_i32 = arith.constant 64 : i32
    %18 = arith.muli %arg0, %c64_i32 : i32
    %19 = tpu.iota {dimensions = array<i32: 0>} : vector<64x128xi32>
    %20 = vector.broadcast %18 : i32 to vector<64x128xi32>
    %21 = arith.addi %20, %19 : vector<64x128xi32>
    %c7_i32 = arith.constant 7 : i32
    %22 = vector.broadcast %c7_i32 : i32 to vector<64x128xi32>
    %23 = arith.andi %21, %22 : vector<64x128xi32>
    %24 = arith.sitofp %23 : vector<64x128xi32> to vector<64x128xf32>
    %c63_i32 = arith.constant 63 : i32
    %25 = vector.broadcast %c63_i32 : i32 to vector<64x128xi32>
    %26 = arith.andi %21, %25 : vector<64x128xi32>
    %27 = arith.sitofp %26 : vector<64x128xi32> to vector<64x128xf32>
    %cst_12 = arith.constant 1.250000e-01 : f32
    %28 = vector.broadcast %cst_12 : f32 to vector<64x128xf32>
    %29 = arith.mulf %27, %28 : vector<64x128xf32>
    %30 = math.floor %29 : vector<64x128xf32>
    %cst_13 = arith.constant 1.250000e-01 : f32
    %31 = vector.broadcast %cst_13 : f32 to vector<64x128xf32>
    %32 = arith.mulf %24, %31 : vector<64x128xf32>
    %cst_14 = arith.constant 1.250000e-01 : f32
    %33 = vector.broadcast %cst_14 : f32 to vector<64x128xf32>
    %34 = arith.mulf %30, %33 : vector<64x128xf32>
    %35 = arith.negf %16 : vector<64x128xf32>
    %36 = math.exp %35 : vector<64x128xf32>
    %cst_15 = arith.constant 1.000000e+00 : f32
    %37 = vector.broadcast %cst_15 : f32 to vector<64x128xf32>
    %38 = arith.addf %37, %36 : vector<64x128xf32>
    %39 = arith.divf %37, %38 : vector<64x128xf32>
    %cst_16 = arith.constant 8.000000e+01 : f32
    %40 = vector.broadcast %cst_16 : f32 to vector<64x128xf32>
    %41 = arith.minimumf %16, %40 : vector<64x128xf32>
    %42 = math.exp %41 : vector<64x128xf32>
    %c2_i32 = arith.constant 2 : i32
    %43 = vector.broadcast %c2_i32 : i32 to vector<64x128xi32>
    %44 = arith.cmpi slt, %17, %43 : vector<64x128xi32>
    %c4_i32 = arith.constant 4 : i32
    %45 = vector.broadcast %c4_i32 : i32 to vector<64x128xi32>
    %46 = arith.cmpi eq, %17, %45 : vector<64x128xi32>
    %47 = arith.ori %44, %46 : vector<64x128xi1>
    %c2_i32_17 = arith.constant 2 : i32
    %48 = vector.broadcast %c2_i32_17 : i32 to vector<64x128xi32>
    %49 = arith.cmpi eq, %17, %48 : vector<64x128xi32>
    %c3_i32 = arith.constant 3 : i32
    %50 = vector.broadcast %c3_i32 : i32 to vector<64x128xi32>
    %51 = arith.cmpi eq, %17, %50 : vector<64x128xi32>
    %52 = arith.ori %49, %51 : vector<64x128xi1>
    %c0_i32 = arith.constant 0 : i32
    %53 = vector.broadcast %c0_i32 : i32 to vector<64x128xi32>
    %54 = arith.cmpi eq, %17, %53 : vector<64x128xi32>
    %c1_i32 = arith.constant 1 : i32
    %55 = vector.broadcast %c1_i32 : i32 to vector<64x128xi32>
    %56 = arith.cmpi eq, %17, %55 : vector<64x128xi32>
    %cst_18 = arith.constant 0.000000e+00 : f32
    %57 = vector.broadcast %cst_18 : f32 to vector<64x128xf32>
    %58 = arith.select %56, %34, %57 : vector<64x128xi1>, vector<64x128xf32>
    %59 = arith.select %54, %32, %58 : vector<64x128xi1>, vector<64x128xf32>
    %c0_19 = arith.constant 0 : index
    %c0_20 = arith.constant 0 : index
    %60 = vector.load %arg6[%c0_19, %c0_20] : memref<1x128xf32, #tpu.memory_space<vmem>>, vector<1x128xf32>
    %61 = vector.broadcast %60 : vector<1x128xf32> to vector<64x128xf32>
    %62 = arith.mulf %61, %39 : vector<64x128xf32>
    %63 = arith.addf %62, %59 : vector<64x128xf32>
    %c0_21 = arith.constant 0 : index
    %c0_22 = arith.constant 0 : index
    %64 = vector.load %arg7[%c0_21, %c0_22] : memref<1x128xf32, #tpu.memory_space<vmem>>, vector<1x128xf32>
    %65 = vector.broadcast %64 : vector<1x128xf32> to vector<64x128xf32>
    %66 = arith.mulf %65, %42 : vector<64x128xf32>
    %67 = arith.select %52, %66, %16 : vector<64x128xi1>, vector<64x128xf32>
    %68 = arith.select %47, %63, %67 : vector<64x128xi1>, vector<64x128xf32>
    %c0_23 = arith.constant 0 : index
    %c0_24 = arith.constant 0 : index
    %69 = vector.load %arg8[%c0_23, %c0_24] : memref<64x128xf32, #tpu.memory_space<vmem>>, vector<64x128xf32>
    tpu.vector_store %arg8[%c0_23, %c0_24], %68 {strides = array<i32>} : memref<64x128xf32, #tpu.memory_space<vmem>>, vector<64x128xf32>,
    return
  }
  func.func @transform_0(%arg0: i32) -> (i32, i32) {
    %c0_i32 = arith.constant 0 : i32
    %c0_i32_0 = arith.constant 0 : i32
    return %arg0, %c0_i32 : i32, i32
  }
  func.func @transform_1(%arg0: i32) -> (i32, i32) {
    %c0_i32 = arith.constant 0 : i32
    %c0_i32_0 = arith.constant 0 : i32
    %c0_i32_1 = arith.constant 0 : i32
    return %c0_i32, %c0_i32_0 : i32, i32
  }
  func.func @transform_2(%arg0: i32) -> (i32, i32) {
    %c0_i32 = arith.constant 0 : i32
    %c0_i32_0 = arith.constant 0 : i32
    %c0_i32_1 = arith.constant 0 : i32
    return %c0_i32, %c0_i32_0 : i32, i32
  }
  func.func @transform_3(%arg0: i32) -> (i32, i32) {
    %c0_i32 = arith.constant 0 : i32
    %c0_i32_0 = arith.constant 0 : i32
    %c0_i32_1 = arith.constant 0 : i32
    return %c0_i32, %c0_i32_0 : i32, i32
  }
  func.func @transform_4(%arg0: i32) -> (i32, i32) {
    %c0_i32 = arith.constant 0 : i32
    %c0_i32_0 = arith.constant 0 : i32
    %c0_i32_1 = arith.constant 0 : i32
    return %c0_i32, %c0_i32_0 : i32, i32
  }
  func.func @transform_5(%arg0: i32) -> (i32, i32) {
    %c0_i32 = arith.constant 0 : i32
    %c0_i32_0 = arith.constant 0 : i32
    %c0_i32_1 = arith.constant 0 : i32
    return %c0_i32, %c0_i32_0 : i32, i32
  }
  func.func @transform_6(%arg0: i32) -> (i32, i32) {
    %c0_i32 = arith.constant 0 : i32
    %c0_i32_0 = arith.constant 0 : i32
    %c0_i32_1 = arith.constant 0 : i32
    return %c0_i32, %c0_i32_0 : i32, i32
  }
  func.func @transform_7(%arg0: i32) -> (i32, i32) {
    %c0_i32 = arith.constant 0 : i32
    %c0_i32_0 = arith.constant 0 : i32
    return %arg0, %c0_i32 : i32, i32
  }
}

</mosaic_0001>

<bundles_post_ra>
// kernel: yogo_forward.1
= control target key start
LH: loop header
LB: loop body
LE: loop exit
PB: predicated region body
PF: predicated region fallthrough
CT: control target
= control target key end

     0   :  { %12 = vsyncpa [#allocation3], 0  ;;  %s1666_s0 = inlined_call_operand.vmem [shape: bf16[128,128], index: 0, kind: input, shape index: {}]   ;;  %s1667_s1 = inlined_call_operand.vmem [shape: bf16[128,128], index: 1, kind: input, shape index: {}]   ;;  %s1668_s2 = inlined_call_operand.vmem [shape: f32[1,128], index: 2, kind: input, shape index: {}]   ;;  %s1669_s3 = inlined_call_operand.vmem [shape: bf16[128,128], index: 3, kind: input, shape index: {}]   ;;  %s1670_s4 = inlined_call_operand.vmem [shape: f32[1,128], index: 4, kind: input, shape index: {}]   ;;  %s1671_s5 = inlined_call_operand.vmem [shape: f32[1,128], index: 5, kind: input, shape index: {}]   ;;  %s1672_s6 = inlined_call_operand.vmem [shape: f32[1,128], index: 6, kind: input, shape index: {}]   ;;  %s1673_s7 = inlined_call_operand.hbm [shape: f32[128,128], index: 7, kind: output, shape index: {}]  }
   0x1   :  { %14 = vsyncpa [#allocation3 + $0x1], 0  ;;  %s1266_s24 = smov 0   ;;  %s1268_s25 = smov 0  }
   0x2   :  { %s1270_s26 = smov 0   ;;  %s1272_s27 = smov 0  }
   0x3 LB: > { %s1287_s28 = sadd.s32 4294967295, %s1221_s27   ;;  %s932_s29 = sadd.s32 4294967294, %s1221_s27   ;;  %s1221_s27 = sphi %s1272_s27, %s1683_s27   ;;  %s1217_s26 = sphi %s1270_s26, %s1682_s26   ;;  %s1213_s25 = sphi %s1268_s25, %s1681_s25   ;;  %s1209_s24 = sphi %s1266_s24, %s1680_s24  }
   0x4   : > { %s1291_s30 = sadd.s32 1, %s1221_s27   ;;  %s179_s8 = sadd.s32 1, %s1217_s26 }
   0x5   : > { %s176_s9 = ssub.s32 %s1221_s27, %s1291_s30  ;;  %p189_p0 = scmp.ne.s32.totalorder %s1217_s26, %s1213_s25 }
   0x6   : > { %p177_p1 = scmp.eq.s32.totalorder %s176_s9, 0  ;;  %p190_p2 = scmp.eq.s32.totalorder %s1287_s28, 1 }
   0x7   : > { %p195_p3 = scmp.ne.s32.totalorder %s1213_s25, %s1209_s24  ;;  %p196_p4 = scmp.eq.s32.totalorder %s932_s29, 1 }
   0x8   : > { %s1302_s10 = scalar_select %p177_p1, %s1217_s26, %s179_s8  }
   0x9   : > { %p1304_p5 = por %p190_p2, %p189_p0  ;;  %p1308_p6 = por %p196_p4, %p195_p3 }
   0xa   : > { %p935_p7 = scmp.ge.s32.totalorder %s1221_s27, 1  ;;  %p241_p8 = scmp.lt.s32.totalorder %s1221_s27, 3 }
   0xc   : > { %p242_p9 = pnand %p935_p7, %p241_p8 }
   0xd   : > { %v1091_v0 = vld [vmem:[%s1667_s1] sm:$0xff] (!%p242_p9)   ;;  %s937_s15 = sshll.u32 (!%p242_p9), %s1287_s28, 3  ;;  %v1092_v1 = vld [vmem:[%s1667_s1 + $0x8] sm:$0xff] (!%p242_p9)   ;;  %v1093_v2 = vld [vmem:[%s1667_s1 + $0x10] sm:$0xff] (!%p242_p9)   ;;  %v613_v57 = vlaneseq (!%p242_p9)  ;;  %s961_s8 = sshll.u32 (!%p242_p9), %s1287_s28, 6 }
   0xe   : > { %245 = sbr.rel (%p242_p9) target bundleno = 545 (0x221), region = 48  ;;  %p274_p10 = scmp.lt.s32.totalorder (!%p242_p9), %s937_s15, 15  ;;  %1002 = vmatprep.subr.bf16.mxu0 (!%p242_p9), %v1091_v0  ;;  %v1094_v3 = vld [vmem:[%s1667_s1 + $0x18] sm:$0xff] (!%p242_p9)   ;;  %v1095_v5 = vld [vmem:[%s1667_s1 + $0x20] sm:$0xff] (!%p242_p9)   ;;  %v1104_v7 = vld [vmem:[%s1669_s3 + $0x8] sm:$0xff] (!%p242_p9)   ;;  %v1379_v60 = vstv (!%p242_p9), %s961_s8 }
   0xf   : > { %1003 = vmatpush3.bf16.msra.mxu0 (!%p242_p9), %v1091_v0  ;;  %v1103_v6 = vld [vmem:[%s1669_s3] sm:$0xff] (!%p242_p9)   ;;  %v1096_v8 = vld [vmem:[%s1667_s1 + $0x28] sm:$0xff] (!%p242_p9)   ;;  %v1105_v9 = vld [vmem:[%s1669_s3 + $0x10] sm:$0xff] (!%p242_p9)   ;;  %v1375_v58 = vshrl.u32 (!%p242_p9), %v613_v57, 7  ;;  %s270_s14 = sand.u32 (!%p242_p9), 1, %s1213_s25   ;;  %s977_s21 = sshll.u32 (!%p242_p9), %s1287_s28, 10 }
  0x10   : > { %1004 = vmatprep.subr.bf16.mxu0 (!%p242_p9), %v1092_v1  ;;  %1026 = vmatprep.subr.bf16.mxu1 (!%p242_p9), %v1103_v6  ;;  %v1097_v10 = vld [vmem:[%s1667_s1 + $0x30] sm:$0xff] (!%p242_p9)   ;;  %v1106_v11 = vld [vmem:[%s1669_s3 + $0x18] sm:$0xff] (!%p242_p9)   ;;  %v1107_v13 = vld [vmem:[%s1669_s3 + $0x20] sm:$0xff] (!%p242_p9)   ;;  %s1508_s19 = sshll.u32 (!%p242_p9), %s270_s14, 6  ;;  %s1613_s8 = scalar_lea.hbm (!%p242_p9), %s1673_s7, %s977_s21 }
  0x11   : > { %1027 = vmatpush3.bf16.msra.mxu1 (!%p242_p9), %v1103_v6  ;;  %v1098_v12 = vld [vmem:[%s1667_s1 + $0x38] sm:$0xff] (!%p242_p9)   ;;  %v1108_v17 = vld [vmem:[%s1669_s3 + $0x28] sm:$0xff] (!%p242_p9)   ;;  %v1109_v18 = vld [vmem:[%s1669_s3 + $0x30] sm:$0xff] (!%p242_p9)   ;;  %v619_v59 = vadd.s32 (!%p242_p9), 16, %v1375_v58  ;;  %v620_v0 = vadd.s32 (!%p242_p9), 24, %v1375_v58  ;;  %s1625_s28 = scalar_lea.sflag (!%p242_p9), [#allocation3], %s270_s14 }
  0x12   : > { %1028 = vmatprep.subr.bf16.mxu1 (!%p242_p9), %v1104_v7  ;;  %v1110_v19 = vld [vmem:[%s1669_s3 + $0x38] sm:$0xff] (!%p242_p9)   ;;  %v939_v20 = vld [vmem:[%s1668_s2] ss:$0 sm:$0xff] (!%p242_p9)  ;;  %s1223_s13 = smov (!%p242_p9), [#allocation2]  }
  0x13   : > { %1005 = vmatpush3.bf16.msra.mxu0 (!%p242_p9), %v1092_v1  ;;  %v628_v61 = vadd.s32 (!%p242_p9), %v1379_v60, %v619_v59 }
  0x14   : > { %1006 = vmatprep.subr.bf16.mxu0 (!%p242_p9), %v1093_v2 }
  0x15   : > { %s1685_s15 = smov (!%p274_p10, %s937_s15), 15  ;;  %1029 = vmatpush3.bf16.msra.mxu1 %v1104_v7  ;;  %v652_v62 = vand.u32 63, %v628_v61 }
  0x16   : > { %s938_s20 = sshll.u32 %s1685_s15, 2  ;;  %1030 = vmatprep.subr.bf16.mxu1 %v1105_v9  ;;  %s1163_s15 = sshll.u32 %s1223_s13, 4  ;;  %s1164_s15 = int_to_ptr.vmem [resolvable:$false] %s1163_s15 }
  0x17   : > { %s1327_s23 = scalar_lea.vmem %s1666_s0, %s938_s20  ;;  %1007 = vmatpush3.bf16.msra.mxu0 %v1093_v2  ;;  %v660_v63 = vcvt.s32.f32 %v652_v62  ;;  %v626_v2 = vadd.s32 %v1379_v60, %v1375_v58  ;;  %s1548_s20 = scalar_lea.vmem [#allocation2], %s1508_s19 }
  0x18   : > { %v1099_v4 = vld [vmem:[%s1327_s23] sm:$0xff]   ;;  %1008 = vmatprep.subr.bf16.mxu0 %v1094_v3  ;;  %v1100_v14 = vld [vmem:[%s1327_s23 + $0x8] sm:$0xff]   ;;  %v1101_v15 = vld [vmem:[%s1327_s23 + $0x10] sm:$0xff]   ;;  %s870_s22 = sshll.u32 %s1548_s20, 4  ;;  %s1165_s16 = scalar_lea.vmem %s1164_s15, 2048  ;;  %s1615_s22 = int_to_ptr.vmem [resolvable:$true] %s870_s22 }
  0x19   : > { %1018 = vmatprep.mubr.bf16.mxu0 %v1099_v4  ;;  %1031 = vmatpush3.bf16.msra.mxu1 %v1105_v9  ;;  %v1102_v16 = vld [vmem:[%s1327_s23 + $0x18] sm:$0xff]   ;;  %v668_v1 = vmul.f32 0.125, %v660_v63  ;;  %v618_v4 = vadd.s32 8, %v1375_v58  ;;  %v650_v7 = vand.u32 63, %v626_v2  ;;  %s1159_s9 = scalar_lea.vmem %s1615_s22, 1024  ;;  %p1166_p0 = scmp.lt.s32.totalorder %s1615_s22, %s1164_s15 }
  0x1a   : > { %1032 = vmatprep.subr.bf16.mxu1 %v1106_v11  ;;  %p1160_p11 = scmp.ne.s32.totalorder %s1615_s22, %s1159_s9  ;;  %p1167_p1 = scmp.lt.s32.totalorder %s1165_s16, %s1159_s9 }
  0x1b   : > { %1009 = vmatpush3.bf16.msra.mxu0 %v1094_v3  ;;  %v629_v3 = vadd.s32 %v1379_v60, %v620_v0  ;;  %v676_v6 = vfloor.f32 %v668_v1  ;;  %v1388_v9 = vadd.s32 %v1379_v60, %v618_v4 }
  0x1c   : > { %1010 = vmatprep.subr.bf16.mxu0 %v1095_v5  ;;  %p1161_p12 = pnand %p1160_p11, %p1304_p5  ;;  %p1168_p2 = por %p1167_p1, %p1166_p0 }
  0x1d   : > { %1033 = vmatpush3.bf16.msra.mxu1 %v1106_v11 }
  0x1e   : > { %1034 = vmatprep.subr.bf16.mxu1 %v1107_v13  ;;  %p1162_p13 = pneg %p1161_p12 }
  0x1f   : > { %1011 = vmatpush3.bf16.msra.mxu0 %v1095_v5  ;;  %v636_v5 = vand.u32 7, %v628_v61 }
  0x20   : > { %1012 = vmatprep.subr.bf16.mxu0 %v1096_v8  ;;  %p1169_p3 = pnand %p1168_p2, %p1162_p13 }
  0x21   : > { %1035 = vmatpush3.bf16.msra.mxu1 %v1107_v13  ;;  %v644_v11 = vcvt.s32.f32 %v636_v5  ;;  %v658_v13 = vcvt.s32.f32 %v650_v7 }
  0x22   : > { %1036 = vmatprep.subr.bf16.mxu1 %v1108_v17 }
  0x23   : > { %1013 = vmatpush3.bf16.msra.mxu0 %v1096_v8  ;;  %v653_v8 = vand.u32 63, %v629_v3 }
  0x24   : > { %1014 = vmatprep.subr.bf16.mxu0 %v1097_v10 }
  0x25   : > { %1037 = vmatpush3.bf16.msra.mxu1 %v1108_v17 }
  0x26   : > { %1038 = vmatprep.subr.bf16.mxu1 %v1109_v18 }
  0x27   : > { %1015 = vmatpush3.bf16.msra.mxu0 %v1097_v10  ;;  %v1390_v10 = vand.u32 127, %v613_v57 }
  0x28   : > { %1016 = vmatprep.subr.bf16.mxu0 %v1098_v12 }
  0x29   : > { %1039 = vmatpush3.bf16.msra.mxu1 %v1109_v18  ;;  %vm777_vm8 = vcmp.eq.s32.totalorder %v1390_v10, 1  ;;  %vm776_vm9 = vcmp.eq.s32.totalorder %v1390_v10, 0  ;;  %v634_v18 = vand.u32 7, %v626_v2  ;;  %v622_v2 = vadd.s32 40, %v1375_v58 }
  0x2a   : > { %1040 = vmatprep.subr.bf16.mxu1 %v1110_v19  ;;  %vm773_vm10 = vcmp.eq.s32.totalorder %v1390_v10, 2  ;;  %vm774_vm11 = vcmp.eq.s32.totalorder %v1390_v10, 3  ;;  %vm770_vm12 = vcmp.lt.s32.totalorder %v1390_v10, 2  ;;  %vm771_vm13 = vcmp.eq.s32.totalorder %v1390_v10, 4 }
  0x2b   : > { %1017 = vmatpush3.bf16.msra.mxu0 %v1098_v12  ;;  %v692_v12 = vmul.f32 0.125, %v676_v6  ;;  %vm1516_vm14 = vmor %vm773_vm10, %vm774_vm11 }
  0x2c   : > { %vm1528_vm15 = vmor %vm770_vm12, %vm771_vm13 }
  0x2d   : > { %1041 = vmatpush3.bf16.msra.mxu1 %v1110_v19  ;;  %v780_v17 = vsel %vm777_vm8, %v692_v12, 0.0  ;;  %v666_v19 = vmul.f32 0.125, %v658_v13 }
  0x2e   : > { %1019 = vmatmul.mubr.bf16.vlgmr.msra.gmra.mrb[0].mxu0 %v1100_v14  ;;  %v661_v14 = vcvt.s32.f32 %v653_v8 }
  0x2f   : > { %1022 = vmatprep.mubr.bf16.mxu0 %v1101_v15  ;;  %v651_v15 = vand.u32 63, %v1388_v9 }
  0x36   : > { %1023 = vmatmul.mubr.bf16.gmra.mrb[4].mxu0 %v1102_v16  ;;  %v684_v16 = vmul.f32 0.125, %v644_v11 }
 0x101   : > { %v1020_v21 = vpop.f32.mrb[0].mxu0 }
 0x102   : > { %v427_v22 = vadd.f32 %v1020_v21, %v939_v20  ;;  %v418_v23 = vpop.f32.mrb[1].mxu0  ;;  %v1400_v21 = vld [vmem:[%s1670_s4] ss:$0 sm:$0xff] }
 0x103   : > { %v419_v24 = vadd.f32 %v939_v20, %v418_v23  ;;  %v1021_v25 = vpop.f32.mrb[2].mxu0  ;;  %v623_v23 = vadd.s32 48, %v1375_v58 }
 0x104   : > { %v459_v26 = vmul.f32 0.01, %v427_v22  ;;  %v430_v27 = vadd.f32 %v1021_v25, %v939_v20  ;;  %v421_v28 = vpop.f32.mrb[3].mxu0  ;;  %vm451_vm0 = vcmp.gt.f32.partialorder %v427_v22, 0.0 }
 0x105   : > { %v457_v29 = vmul.f32 0.01, %v419_v24  ;;  %v422_v30 = vadd.f32 %v939_v20, %v421_v28  ;;  %vm449_vm2 = vcmp.gt.f32.partialorder %v419_v24, 0.0 }
 0x106   : > { %vm452_vm1 = vcmp.gt.f32.partialorder %v430_v27, 0.0  ;;  %v460_v31 = vmul.f32 0.01, %v430_v27  ;;  %v467_v33 = vsel %vm451_vm0, %v427_v22, %v459_v26  ;;  %v637_v22 = vand.u32 7, %v629_v3 }
 0x107   : > { %v458_v32 = vmul.f32 0.01, %v422_v30  ;;  %vm450_vm3 = vcmp.gt.f32.partialorder %v422_v30, 0.0  ;;  %v465_v36 = vsel %vm449_vm2, %v419_v24, %v457_v29  ;;  %v659_v24 = vcvt.s32.f32 %v651_v15 }
 0x108   : > { %v468_v34 = vsel %vm452_vm1, %v430_v27, %v460_v31  ;;  %v1405_v26 = vsel %vm776_vm9, %v684_v16, %v780_v17  ;;  %v642_v29 = vcvt.s32.f32 %v634_v18 }
 0x109   : > { %v1024_v35 = vpop.f32.mrb[4].mxu0  ;;  %v466_v37 = vsel %vm450_vm3, %v422_v30, %v458_v32  ;;  %v474_v38 = vpack.c.bf16 %v468_v34, %v467_v33  ;;  %v674_v30 = vfloor.f32 %v666_v19  ;;  %v645_v34 = vcvt.s32.f32 %v637_v22 }
 0x10a   : > { %v443_v39 = vadd.f32 %v1024_v35, %v939_v20  ;;  %v434_v40 = vpop.f32.mrb[5].mxu0  ;;  %v473_v41 = vpack.c.bf16 %v466_v37, %v465_v36  ;;  %v1414_v35 = vadd.s32 %v1379_v60, %v623_v23  ;;  %v621_v36 = vadd.s32 32, %v1375_v58 }
 0x10b   : > { %v435_v42 = vadd.f32 %v939_v20, %v434_v40  ;;  %v1025_v43 = vpop.f32.mrb[6].mxu0  ;;  %v1436_v57 = vmul.f32 0.125, %v645_v34 }
 0x10c   : > { %v463_v44 = vmul.f32 0.01, %v443_v39  ;;  %v446_v45 = vadd.f32 %v1025_v43, %v939_v20  ;;  %v437_v46 = vpop.f32.mrb[7].mxu0  ;;  %1042 = vmatprep.mubr.bf16.mxu1 %v473_v41  ;;  %vm455_vm4 = vcmp.gt.f32.partialorder %v443_v39, 0.0  ;;  %v667_v41 = vmul.f32 0.125, %v659_v24 }
 0x10d   : > { %v461_v47 = vmul.f32 0.01, %v435_v42  ;;  %v438_v48 = vadd.f32 %v939_v20, %v437_v46  ;;  %1043 = vmatmul.mubr.bf16.vlgmr.msra.gmra.mrb[0].mxu1 %v474_v38  ;;  %vm453_vm5 = vcmp.gt.f32.partialorder %v435_v42, 0.0  ;;  %v669_v20 = vmul.f32 0.125, %v661_v14 }
 0x10e   : > { %vm456_vm6 = vcmp.gt.f32.partialorder %v446_v45, 0.0  ;;  %v464_v49 = vmul.f32 0.01, %v446_v45  ;;  %v471_v51 = vsel %vm455_vm4, %v443_v39, %v463_v44  ;;  %v682_v46 = vmul.f32 0.125, %v642_v29 }
 0x10f   : > { %vm454_vm7 = vcmp.gt.f32.partialorder %v438_v48, 0.0  ;;  %v462_v50 = vmul.f32 0.01, %v438_v48  ;;  %v469_v53 = vsel %vm453_vm5, %v435_v42, %v461_v47  ;;  %v677_v31 = vfloor.f32 %v669_v20 }
 0x110   : > { %v472_v52 = vsel %vm456_vm6, %v446_v45, %v464_v49  ;;  %v624_v45 = vadd.s32 56, %v1375_v58  ;;  %v690_v47 = vmul.f32 0.125, %v674_v30  ;;  %v675_v59 = vfloor.f32 %v667_v41 }
 0x111   : > { %v470_v54 = vsel %vm454_vm7, %v438_v48, %v462_v50  ;;  %v476_v55 = vpack.c.bf16 %v472_v52, %v471_v51  ;;  %v656_v50 = vand.u32 63, %v1414_v35  ;;  %v1431_v51 = vadd.s32 %v1379_v60, %v621_v36 }
 0x112   : > { %v475_v56 = vpack.c.bf16 %v470_v54, %v469_v53  ;;  %v693_v52 = vmul.f32 0.125, %v677_v31  ;;  %v635_v54 = vand.u32 7, %v1388_v9  ;;  %v1443_v1 = vadd.s32 %v1379_v60, %v624_v45 }
 0x113   : > { %v664_v3 = vcvt.s32.f32 %v656_v50  ;;  %v654_v5 = vand.u32 63, %v1431_v51  ;;  %v778_v14 = vsel %vm777_vm8, %v690_v47, 0.0  ;;  %v691_v18 = vmul.f32 0.125, %v675_v59 }
 0x114   : > { %1046 = vmatprep.mubr.bf16.mxu1 %v475_v56  ;;  %v643_v17 = vcvt.s32.f32 %v635_v54  ;;  %v657_v19 = vand.u32 63, %v1443_v1  ;;  %v1465_v24 = vadd.s32 %v1379_v60, %v622_v2  ;;  %v1473_v60 = vsel %vm776_vm9, %v682_v46, %v778_v14 }
 0x115   : > { %1047 = vmatmul.mubr.bf16.gmra.mrb[4].mxu1 %v476_v55  ;;  %v662_v22 = vcvt.s32.f32 %v654_v5  ;;  %v672_v29 = vmul.f32 0.125, %v664_v3  ;;  %v781_v34 = vsel %vm777_vm8, %v693_v52, 0.0  ;;  %v640_v46 = vand.u32 7, %v1414_v35 }
 0x116   : > { %v665_v36 = vcvt.s32.f32 %v657_v19  ;;  %v655_v41 = vand.u32 63, %v1465_v24  ;;  %v683_v45 = vmul.f32 0.125, %v643_v17  ;;  %v638_v54 = vand.u32 7, %v1431_v51  ;;  %v1494_v51 = vld [vmem:[%s1672_s6] ss:$0 sm:$0xff] }
 0x117   : > { %v648_v2 = vcvt.s32.f32 %v640_v46 }
 0x1e0   : > { %v1044_v25 = vpop.f32.mrb[0].mxu1 }
 0x1e1   : > { %v1408_v27 = vadd.f32 %v1044_v25, %v1400_v21  ;;  %v582_v28 = vpop.f32.mrb[1].mxu1 }
 0x1e2   : > { %v1411_v32 = vadd.f32 %v1400_v21, %v582_v28  ;;  %v1045_v33 = vpop.f32.mrb[2].mxu1 }
 0x1e3   : > { %v964_v37 = vmul.f32 -1.442695, %v1408_v27  ;;  %v748_v38 = vmin.f32 %v1408_v27, 80.0  ;;  %v1420_v39 = vadd.f32 %v1045_v33, %v1400_v21  ;;  %v585_v40 = vpop.f32.mrb[3].mxu1 }
 0x1e4   : > { %v962_v42 = vmul.f32 -1.442695, %v1411_v32  ;;  %v746_v43 = vmin.f32 %v1411_v32, 80.0  ;;  %v1425_v44 = vadd.f32 %v1400_v21, %v585_v40 }
 0x1e5   : > { %1111 = vpow2.f32 %v964_v37  ;;  %v965_v48 = vmul.f32 -1.442695, %v1420_v39  ;;  %v758_v49 = vmul.f32 1.442695, %v748_v38  ;;  %v749_v53 = vmin.f32 %v1420_v39, 80.0 }
 0x1e6   : > { %1113 = vpow2.f32 %v962_v42  ;;  %v963_v55 = vmul.f32 -1.442695, %v1425_v44  ;;  %v754_v56 = vmul.f32 1.442695, %v746_v43  ;;  %v747_v61 = vmin.f32 %v1425_v44, 80.0 }
 0x1e7   : > { %1115 = vpow2.f32 %v965_v48  ;;  %v760_v7 = vmul.f32 1.442695, %v749_v53  ;;  %v670_v38 = vmul.f32 0.125, %v662_v22  ;;  %v779_v48 = vsel %vm777_vm8, %v691_v18, 0.0 }
 0x1e8   : > { %v1048_v62 = vpop.f32.mrb[4].mxu1  ;;  %1117 = vpow2.f32 %v758_v49  ;;  %v756_v12 = vmul.f32 1.442695, %v747_v61  ;;  %v680_v49 = vfloor.f32 %v672_v29  ;;  %v663_v61 = vcvt.s32.f32 %v655_v41 }
 0x1e9   : > { %v1440_v63 = vadd.f32 %v1048_v62, %v1400_v21  ;;  %v598_v0 = vpop.f32.mrb[5].mxu1  ;;  %1119 = vpow2.f32 %v963_v55  ;;  %v673_v55 = vmul.f32 0.125, %v665_v36  ;;  %v678_v59 = vfloor.f32 %v670_v38 }
 0x1ea   : > { %v1447_v4 = vadd.f32 %v1400_v21, %v598_v0  ;;  %v1049_v6 = vpop.f32.mrb[6].mxu1  ;;  %1121 = vpow2.f32 %v754_v56  ;;  %v1488_v0 = vsel %vm776_vm9, %v1436_v57, %v781_v34  ;;  %v1500_v57 = vld [vmem:[%s1671_s5] ss:$0 sm:$0xff]  ;;  %v671_v17 = vmul.f32 0.125, %v663_v61 }
 0x1eb   : > { %v968_v8 = vmul.f32 -1.442695, %v1440_v63  ;;  %v1452_v9 = vadd.f32 %v1049_v6, %v1400_v21  ;;  %v601_v11 = vpop.f32.mrb[7].mxu1  ;;  %v752_v58 = vmin.f32 %v1440_v63, 80.0  ;;  %v696_v6 = vmul.f32 0.125, %v680_v49 }
 0x1ec   : > { %v966_v13 = vmul.f32 -1.442695, %v1447_v4  ;;  %v1460_v16 = vadd.f32 %v1400_v21, %v601_v11  ;;  %v750_v23 = vmin.f32 %v1447_v4, 80.0 }
 0x1ed   : > { %1123 = vpow2.f32 %v968_v8  ;;  %v969_v15 = vmul.f32 -1.442695, %v1452_v9  ;;  %v766_v30 = vmul.f32 1.442695, %v752_v58  ;;  %v753_v31 = vmin.f32 %v1452_v9, 80.0 }
 0x1ee   : > { %1125 = vpow2.f32 %v966_v13  ;;  %v967_v33 = vmul.f32 -1.442695, %v1460_v16  ;;  %v762_v40 = vmul.f32 1.442695, %v750_v23  ;;  %v751_v35 = vmin.f32 %v1460_v16, 80.0 }
 0x1ef   : > { %v1112_v20 = vpop.eup %1111  ;;  %1127 = vpow2.f32 %v760_v7  ;;  %v768_v50 = vmul.f32 1.442695, %v753_v31  ;;  %v641_v8 = vand.u32 7, %v1443_v1  ;;  %v646_v58 = vcvt.s32.f32 %v638_v54 }
 0x1f0   : > { %v1114_v25 = vpop.eup %1113  ;;  %v724_v28 = vadd.f32 1.0, %v1112_v20  ;;  %1129 = vpow2.f32 %v756_v12  ;;  %v1504_v12 = vsel %vm776_vm9, %v683_v45, %v779_v48  ;;  %v681_v13 = vfloor.f32 %v673_v55 }
 0x1f1   : > { %v722_v21 = vadd.f32 1.0, %v1114_v25  ;;  %1131 = vpow2.f32 %v969_v15  ;;  %v1116_v37 = vpop.eup %1115  ;;  %v694_v15 = vmul.f32 0.125, %v678_v59  ;;  %v764_v18 = vmul.f32 1.442695, %v751_v35 }
 0x1f2   : > { %1133 = vrcp.f32 %v724_v28  ;;  %v1118_v42 = vpop.eup %1117  ;;  %v725_v43 = vadd.f32 1.0, %v1116_v37  ;;  %v688_v20 = vmul.f32 0.125, %v648_v2  ;;  %v639_v23 = vand.u32 7, %v1465_v24 }
 0x1f3   : > { %1135 = vrcp.f32 %v722_v21  ;;  %v1120_v47 = vpop.eup %1119  ;;  %v826_v19 = vmul.f32 %v1118_v42, %v1494_v51  ;;  %v784_v21 = vsel %vm777_vm8, %v696_v6, 0.0  ;;  %v649_v31 = vcvt.s32.f32 %v641_v8 }
 0x1f4   : > { %1137 = vpow2.f32 %v766_v30  ;;  %v1122_v52 = vpop.eup %1121  ;;  %v723_v53 = vadd.f32 1.0, %v1120_v47  ;;  %v686_v36 = vmul.f32 0.125, %v646_v58  ;;  %v697_v37 = vmul.f32 0.125, %v681_v13 }
 0x1f5   : > { %1139 = vpow2.f32 %v967_v33  ;;  %v824_v30 = vmul.f32 %v1122_v52, %v1494_v51  ;;  %v782_v41 = vsel %vm777_vm8, %v694_v15, 0.0  ;;  %v679_v42 = vfloor.f32 %v671_v17 }
 0x1f6   : > { %1141 = vrcp.f32 %v725_v43  ;;  %v834_v45 = vsel %vm1516_vm14, %v826_v19, %v1408_v27  ;;  %v792_v55 = vsel %vm776_vm9, %v688_v20, %v784_v21  ;;  %v790_v61 = vsel %vm776_vm9, %v686_v36, %v782_v41 }
 0x1f7   : > { %v1124_v56 = vpop.eup %1123  ;;  %1143 = vpow2.f32 %v762_v40  ;;  %v689_v35 = vmul.f32 0.125, %v649_v31  ;;  %v695_v6 = vmul.f32 0.125, %v679_v42 }
 0x1f8   : > { %v1126_v62 = vpop.eup %1125  ;;  %1145 = vrcp.f32 %v723_v53  ;;  %v728_v3 = vadd.f32 1.0, %v1124_v56  ;;  %v647_v53 = vcvt.s32.f32 %v639_v23 }
 0x1f9   : > { %v1128_v5 = vpop.eup %1127  ;;  %v726_v7 = vadd.f32 1.0, %v1126_v62  ;;  %1147 = vpow2.f32 %v768_v50 }
 0x1fa   : > { %v1130_v11 = vpop.eup %1129  ;;  %1149 = vrcp.f32 %v728_v3  ;;  %v827_v47 = vmul.f32 %v1128_v5, %v1494_v51  ;;  %v785_v5 = vsel %vm777_vm8, %v697_v37, 0.0  ;;  %v687_v17 = vmul.f32 0.125, %v647_v53 }
 0x1fb   : > { %v1132_v14 = vpop.eup %1131  ;;  %1151 = vrcp.f32 %v726_v7 }
 0x1fc   : > { %v1134_v1 = vpop.eup %1133  ;;  %v729_v22 = vadd.f32 1.0, %v1132_v14  ;;  %v835_v2 = vsel %vm1516_vm14, %v827_v47, %v1420_v39 }
 0x1fd   : > { %v1136_v25 = vpop.eup %1135  ;;  %v803_v29 = vmul.f32 %v1134_v1, %v1500_v57 }
 0x1fe   : > { %v1138_v33 = vpop.eup %1137  ;;  %v801_v34 = vmul.f32 %v1136_v25, %v1500_v57  ;;  %1153 = vrcp.f32 %v729_v22 }
 0x1ff   : > { %v1140_v38 = vpop.eup %1139  ;;  %v811_v40 = vadd.f32 %v803_v29, %v1405_v26  ;;  %1155 = vpow2.f32 %v764_v18  ;;  %v832_v26 = vsel %vm1516_vm14, %v824_v30, %v1411_v32  ;;  %v830_v3 = vmul.f32 %v1138_v33, %v1494_v51 }
 0x200   : > { %v1142_v43 = vpop.eup %1141  ;;  %v809_v46 = vadd.f32 %v801_v34, %v1473_v60  ;;  %v727_v48 = vadd.f32 1.0, %v1140_v38  ;;  %v825_v60 = vmul.f32 %v1130_v11, %v1494_v51 }
 0x201   : > { %v1144_v49 = vpop.eup %1143  ;;  %v842_v50 = vsel %vm1528_vm15, %v811_v40, %v834_v45  ;;  %v804_v52 = vmul.f32 %v1142_v43, %v1500_v57 }
 0x202   : > { %v1146_v54 = vpop.eup %1145  ;;  %850 = vst [vmem:[%s1548_s20 + $0x10] sm:$0xff] %v842_v50  ;;  %v840_v27 = vsel %vm1528_vm15, %v809_v46, %v832_v26  ;;  %1157 = vrcp.f32 %v727_v48  ;;  %v828_v58 = vmul.f32 %v1144_v49, %v1494_v51  ;;  %v833_v39 = vsel %vm1516_vm14, %v825_v60, %v1425_v44 }
 0x203   : > { %v1148_v56 = vpop.eup %1147  ;;  %848 = vst [vmem:[%s1548_s20] sm:$0xff] %v840_v27  ;;  %v812_v32 = vadd.f32 %v804_v52, %v1488_v0  ;;  %v802_v59 = vmul.f32 %v1146_v54, %v1500_v57  ;;  %v793_v44 = vsel %vm776_vm9, %v689_v35, %v785_v5 }
 0x204   : > { %v1150_v62 = vpop.eup %1149  ;;  %v831_v19 = vmul.f32 %v1148_v56, %v1494_v51  ;;  %v836_v23 = vsel %vm1516_vm14, %v828_v58, %v1447_v4 }
 0x205   : > { %v1152_v7 = vpop.eup %1151  ;;  %v843_v0 = vsel %vm1528_vm15, %v812_v32, %v835_v2  ;;  %v810_v8 = vadd.f32 %v802_v59, %v1504_v12  ;;  %v807_v11 = vmul.f32 %v1150_v62, %v1500_v57  ;;  %v838_v12 = vsel %vm1516_vm14, %v830_v3, %v1440_v63 }
 0x206   : > { %851 = vst [vmem:[%s1548_s20 + $0x18] sm:$0xff] %v843_v0  ;;  %v805_v13 = vmul.f32 %v1152_v7, %v1500_v57  ;;  %v783_v63 = vsel %vm777_vm8, %v695_v6, 0.0  ;;  %v839_v31 = vsel %vm1516_vm14, %v831_v19, %v1452_v9 }
 0x207   : > { %v841_v14 = vsel %vm1528_vm15, %v810_v8, %v833_v39  ;;  %v815_v15 = vadd.f32 %v807_v11, %v792_v55  ;;  %v791_v4 = vsel %vm776_vm9, %v687_v17, %v783_v63 }
 0x208   : > { %v1154_v18 = vpop.eup %1153  ;;  %849 = vst [vmem:[%s1548_s20 + $0x8] sm:$0xff] %v841_v14  ;;  %v813_v1 = vadd.f32 %v805_v13, %v790_v61 }
 0x209   : > { %v1156_v20 = vpop.eup %1155  ;;  %v846_v22 = vsel %vm1528_vm15, %v815_v15, %v838_v12  ;;  %v808_v25 = vmul.f32 %v1154_v18, %v1500_v57 }
 0x20a   : > { %854 = vst [vmem:[%s1548_s20 + $0x30] sm:$0xff] %v846_v22  ;;  %v844_v29 = vsel %vm1528_vm15, %v813_v1, %v836_v23  ;;  %v829_v33 = vmul.f32 %v1156_v20, %v1494_v51 }
 0x20b   : > { %852 = vst [vmem:[%s1548_s20 + $0x20] sm:$0xff] %v844_v29  ;;  %v816_v30 = vadd.f32 %v808_v25, %v793_v44 }
 0x20c   : > { %v1158_v21 = vpop.eup %1157  ;;  %v837_v10 = vsel %vm1516_vm14, %v829_v33, %v1460_v16 }
 0x20d   : > { %v847_v34 = vsel %vm1528_vm15, %v816_v30, %v839_v31  ;;  %v806_v36 = vmul.f32 %v1158_v21, %v1500_v57 }
 0x20e   : > { %855 = vst [vmem:[%s1548_s20 + $0x38] sm:$0xff] %v847_v34 }
 0x20f   : > { %v814_v37 = vadd.f32 %v806_v36, %v791_v4 }
 0x211   : > { %v845_v9 = vsel %vm1528_vm15, %v814_v37, %v837_v10 }
 0x212   : > { %853 = vst [vmem:[%s1548_s20 + $0x28] sm:$0xff] %v845_v9 }
 0x213   : > { %1172 = shalt.err (!%p1169_p3)
}
 0x214   : > { %s1173_s14 = scalar_lea.hbm %s1613_s8, 1024  ;;  %s1177_s19 = scalar_lea.hbm %s1673_s7, 2048 }
 0x215   : > { %p1174_p4 = scmp.ne.s32.totalorder %s1613_s8, %s1173_s14  ;;  %p1178_p9 = scmp.lt.u32.totalorder %s1613_s8, %s1673_s7 }
 0x216   : > { %p1179_p10 = scmp.lt.u32.totalorder %s1177_s19, %s1173_s14  ;;  %p1181_p12 = scmp.lt.u32.totalorder %s1173_s14, %s1613_s8 }
 0x217   : > { %p1175_p7 = pnand %p1174_p4, %p1304_p5 }
 0x218   : > { %p1180_p11 = por %p1179_p10, %p1178_p9 }
 0x219   : > { %p1176_p8 = pneg %p1175_p7 }
 0x21a   : > { %p1182_p13 = por %p1181_p12, %p1180_p11 }
 0x21c   : > { %p1183_p0 = pnand %p1182_p13, %p1176_p8 }
 0x21e   : > { %1186 = shalt.err (!%p1183_p0)
}
 0x21f   : > { %s1224_s23 = smov 128   ;;  %s1225_s29 = smov 8  }
 0x220   : > { %1050 = dma.vmem_to_hbm [thread:$0]  (%p1304_p5), %s1615_s22, 1024, %s1613_s8, %s1625_s28, %s1224_s23, %s1224_s23, %s1225_s29  }
 0x221 PF: > { %p1056_p1 = scmp.ge.s32.totalorder %s1221_s27, 2  ;;  %s885_s9 = sand.u32 1, %s1209_s24  }
 0x222   : > { %s886_s13 = scalar_lea.sflag [#allocation3], %s885_s9 }
 0x223   : > { %p1053_p2 = pnand %p1056_p1, %p1308_p6 }
 0x225   : > { %1204 = dma.done.wait (!%p1053_p2), %s886_s13, 1024  }
 0x226   : > { %1206 = vsyncadd (!%p1053_p2), %s886_s13, 4294966272  ;;  %p17_p3 = scmp.ge.s32.totalorder %s1291_s30, 4   ;;  %s1680_s24 = smov %s1213_s25 }
 0x227   : > { %s1681_s25 = smov %s1217_s26  ;;  %s1682_s26 = smov %s1302_s10 }
 0x228   : > { %s1683_s27 = smov %s1291_s30  ;;  %19 = sbr.rel (!%p17_p3) target bundleno = 3 (0x3), region = 83 }
 0x22f   :  { %891 = vsyncpa [#allocation3], 1 }
 0x230   :  { %893 = vsyncpa [#allocation3 + $0x1], 1 }

</bundles_post_ra>
